<compile_context>
chip_gen: v7x
topology: tpu7x:2x2x1
jax: 0.10.0
libtpu: 0.0.40
codegen_flags: <defaults>
</compile_context>

<pallas_src>
import jax
import jax.numpy as jnp
from jax.experimental import pallas as pl
from jax.experimental.pallas import tpu as pltpu

LANE = 128     # TPU lane width (last vreg dim)
SUBLANE = 8    # f32 sublane count (second-to-last vreg dim)

# Explicit scoped-VMEM limit: 32 MiB is <= physical VMEM on every current
# generation (v5e/v6e: 128 MiB, v7x: 64 MiB) and raises v5e's 16 MiB scoped
# default.  Tiles are sized against the smaller BUDGET to leave headroom for
# compiler scratch / semaphores.
VMEM_LIMIT_BYTES = 32 * 1024 * 1024
VMEM_BUDGET_BYTES = 24 * 1024 * 1024


def _round_up(x, m):
    return ((x + m - 1) // m) * m


def _vmem_tile_bytes(rows, cols, itemsize=4):
    """f32 VMEM footprint of a (rows, cols) tile with (8, 128) layout padding."""
    return _round_up(max(rows, 1), SUBLANE) * _round_up(max(cols, 1), LANE) * itemsize


def _fused_mlp_kernel(x_ref, w_ref, b_ref, o_ref):
    # One MXU matmul per batch tile: (tm, num_input) @ (num_input, num_output).
    h = jnp.dot(x_ref[...], w_ref[...], preferred_element_type=jnp.float32)
    h = h + b_ref[...]
    # Final sigmoid (the only nonlinearity in the reference module), f32 on EUP.
    # If B % tm != 0 the last tile applies sigmoid to padded rows; the masked
    # output store drops them, so this is benign.
    o_ref[...] = jax.nn.sigmoid(h).astype(o_ref.dtype)


def prepare_params(params):
    """Collapse the activation-free linear stack fc3(fc2(fc1(x))) ONCE.

    Hoisted out of the per-call path: every forward would otherwise pay two
    extra XLA matmuls + HBM copies.  Exact algebra; f32 re-association differs
    from the layer-by-layer reference only at the ~1e-7 level for well-scaled
    weights (tolerance used below: 1e-5).
    """
    w1, b1, w2, b2, w3, b3 = params
    w_fused = w1 @ w2 @ w3                    # (num_input, num_output)
    b_fused = b1 @ w2 @ w3 + b2 @ w3 + b3     # (1, num_output)
    return jnp.asarray(w_fused, jnp.float32), jnp.asarray(b_fused, jnp.float32)


def _pick_tile(batch, num_input, num_output, tm_request):
    """Largest 8-aligned batch tile that (a) fits the VMEM budget counting ALL
    buffers, (b) leaves >= 2 grid steps (both v7x TCs usable), (c) <= batch."""
    # Resident weights/bias (budgeted at 2 buffers in case the Buffered(1)
    # fallback path is taken).
    fixed = (2 * _vmem_tile_bytes(num_input, num_output)
             + 2 * _vmem_tile_bytes(1, num_output))
    # Double-buffered x tile + out tile: bytes per batch row, lane-padded.
    per_row = 2 * (_round_up(num_input, LANE) + _round_up(num_output, LANE)) * 4
    tm_vmem = max(SUBLANE,
                  (max(VMEM_BUDGET_BYTES - fixed, 0) // per_row) // SUBLANE * SUBLANE)
    # TODO(synk): for num_input so large that even tm=8 overflows the budget,
    # grid the K axis with a VMEM f32 accumulator (P3) instead of shrinking tm.
    tm_full = _round_up(batch, SUBLANE)
    tm_two_steps = _round_up(pl.cdiv(batch, 2), SUBLANE)
    return max(SUBLANE, min(tm_request, tm_vmem, tm_two_steps, tm_full))


def net_forward(x, fused_params, *, tm=1024):
    """Pallas forward of Net: sigmoid(x @ W_fused + b_fused).

    `fused_params` must come from `prepare_params` (hoisted layer collapse).
    """
    w, b = fused_params
    batch, num_input = x.shape
    num_output = w.shape[1]
    tm = _pick_tile(batch, num_input, num_output, tm)
    grid = (pl.cdiv(batch, tm),)

    def call(single_buffer_weights):
        if single_buffer_weights:
            # Constant index_map -> never re-DMA'd; Buffered(1) drops the second
            # (useless) pipeline buffer, freeing VMEM for a larger batch tile.
            w_spec = pl.BlockSpec((num_input, num_output), lambda i: (0, 0),
                                  pipeline_mode=pl.Buffered(1))
            b_spec = pl.BlockSpec((1, num_output), lambda i: (0, 0),
                                  pipeline_mode=pl.Buffered(1))
        else:
            w_spec = pl.BlockSpec((num_input, num_output), lambda i: (0, 0))
            b_spec = pl.BlockSpec((1, num_output), lambda i: (0, 0))

        return pl.pallas_call(
            _fused_mlp_kernel,
            # Unpadded output: avoids the 128/num_output write amplification and
            # the wrapper-side slice pass (accepts a masked vst instead).
            out_shape=jax.ShapeDtypeStruct((batch, num_output), jnp.float32),
            grid=grid,
            in_specs=[
                pl.BlockSpec((tm, num_input), lambda i: (i, 0)),  # streamed batch tile
                w_spec,
                b_spec,
            ],
            out_specs=pl.BlockSpec((tm, num_output), lambda i: (i, 0)),
            compiler_params=pltpu.CompilerParams(
                dimension_semantics=("parallel",),  # shard batch tiles across v7x TCs
                vmem_limit_bytes=VMEM_LIMIT_BYTES,
            ),
        )(x, w, b)

    try:
        return call(single_buffer_weights=True)
    except Exception:
        # Fallback if this Pallas revision rejects pipeline_mode=Buffered(1).
        return call(single_buffer_weights=False)


def init_params(key, num_input, num_output):
    """Mirror PyTorch nn.Linear default init: U(-1/sqrt(fan_in), 1/sqrt(fan_in)).
    Weights stored as (in_features, out_features); biases as (1, out)."""
    def linear(key, fan_in, fan_out):
        kw, kb = jax.random.split(key)
        bound = 1.0 / jnp.sqrt(jnp.float32(fan_in))
        w = jax.random.uniform(kw, (fan_in, fan_out), jnp.float32, -bound, bound)
        b = jax.random.uniform(kb, (1, fan_out), jnp.float32, -bound, bound)
        return w, b

    k1, k2, k3 = jax.random.split(key, 3)
    w1, b1 = linear(k1, num_input, 32)
    w2, b2 = linear(k2, 32, 16)
    w3, b3 = linear(k3, 16, num_output)
    return w1, b1, w2, b2, w3, b3


if __name__ == "__main__":
    key = jax.random.PRNGKey(0)
    k_params, k_x = jax.random.split(key)

    batch = 8
    num_input = 16
    num_output = 4

    params = init_params(k_params, num_input, num_output)
    fused_params = prepare_params(params)          # hoisted: done once, not per call
    x = jax.random.normal(k_x, (batch, num_input), jnp.float32)

    out = net_forward(x, fused_params)
    out = jax.block_until_ready(out)

    # Pure-JAX reference of the original (unfused) 3-layer forward pass.
    w1, b1, w2, b2, w3, b3 = params
    ref = jax.nn.sigmoid(((x @ w1 + b1) @ w2 + b2) @ w3 + b3)
    assert out.shape == (batch, num_output)
    assert jnp.allclose(out, ref, atol=1e-5, rtol=1e-5)

    print("KERNEL_OK")
</pallas_src>

<mosaic_0001>
module attributes {stable_mosaic.version = 11 : i64} {
  func.func @_fused_mlp_kernel(%arg0: i32, %arg1: memref<8x16xf32, #tpu.memory_space<vmem>>, %arg2: memref<16x4xf32, #tpu.memory_space<vmem>>, %arg3: memref<1x4xf32, #tpu.memory_space<vmem>>, %arg4: memref<8x4xf32, #tpu.memory_space<vmem>>) attributes {dimension_semantics = [#tpu.dimension_semantics<parallel>], iteration_bounds = array<i64: 1>, scalar_prefetch = 0 : i64, scratch_operands = 0 : i64, tpu.core_type = #tpu.core_type<tc>, window_params = [{transform_indices = @transform_0, window_bounds = array<i64: 8, 16>}, {pipeline_mode = #tpu.pipeline_mode<synchronous>, transform_indices = @transform_1, window_bounds = array<i64: 16, 4>}, {pipeline_mode = #tpu.pipeline_mode<synchronous>, transform_indices = @transform_2, window_bounds = array<i64: 1, 4>}, {transform_indices = @transform_3, window_bounds = array<i64: 8, 4>}]} {
    %c0 = arith.constant 0 : index
    %c0_0 = arith.constant 0 : index
    %0 = vector.load %arg1[%c0, %c0_0] : memref<8x16xf32, #tpu.memory_space<vmem>>, vector<8x16xf32>
    %c0_1 = arith.constant 0 : index
    %c0_2 = arith.constant 0 : index
    %1 = vector.load %arg2[%c0_1, %c0_2] : memref<16x4xf32, #tpu.memory_space<vmem>>, vector<16x4xf32>
    %cst = arith.constant dense<0.000000e+00> : vector<8x4xf32>
    %2 = tpu.matmul %0, %1, %cst {dimension_numbers = #tpu.dot_dimension_numbers<[1], [0], [0], [1], [0, 0, 1, 1], [], []>} : vector<8x16xf32>, vector<16x4xf32>, vector<8x4xf32> -> vector<8x4xf32>
    %c0_3 = arith.constant 0 : index
    %c0_4 = arith.constant 0 : index
    %3 = vector.load %arg3[%c0_3, %c0_4] : memref<1x4xf32, #tpu.memory_space<vmem>>, vector<1x4xf32>
    %4 = vector.broadcast %3 : vector<1x4xf32> to vector<8x4xf32>
    %5 = arith.addf %2, %4 : vector<8x4xf32>
    %6 = arith.negf %5 : vector<8x4xf32>
    %7 = math.exp %6 : vector<8x4xf32>
    %cst_5 = arith.constant 1.000000e+00 : f32
    %8 = vector.broadcast %cst_5 : f32 to vector<8x4xf32>
    %9 = arith.addf %8, %7 : vector<8x4xf32>
    %10 = arith.divf %8, %9 : vector<8x4xf32>
    %c0_6 = arith.constant 0 : index
    %c0_7 = arith.constant 0 : index
    %11 = vector.load %arg4[%c0_6, %c0_7] : memref<8x4xf32, #tpu.memory_space<vmem>>, vector<8x4xf32>
    tpu.vector_store %arg4[%c0_6, %c0_7], %10 {strides = array<i32>} : memref<8x4xf32, #tpu.memory_space<vmem>>, vector<8x4xf32>,
    return
  }
  func.func @transform_0(%arg0: i32) -> (i32, i32) {
    %c0_i32 = arith.constant 0 : i32
    %c0_i32_0 = arith.constant 0 : i32
    return %arg0, %c0_i32 : i32, i32
  }
  func.func @transform_1(%arg0: i32) -> (i32, i32) {
    %c0_i32 = arith.constant 0 : i32
    %c0_i32_0 = arith.constant 0 : i32
    %c0_i32_1 = arith.constant 0 : i32
    return %c0_i32, %c0_i32_0 : i32, i32
  }
  func.func @transform_2(%arg0: i32) -> (i32, i32) {
    %c0_i32 = arith.constant 0 : i32
    %c0_i32_0 = arith.constant 0 : i32
    %c0_i32_1 = arith.constant 0 : i32
    return %c0_i32, %c0_i32_0 : i32, i32
  }
  func.func @transform_3(%arg0: i32) -> (i32, i32) {
    %c0_i32 = arith.constant 0 : i32
    %c0_i32_0 = arith.constant 0 : i32
    return %arg0, %c0_i32 : i32, i32
  }
}

module attributes {stable_mosaic.version = 11 : i64} {
  func.func @_fused_mlp_kernel(%arg0: i32, %arg1: memref<8x16xf32, #tpu.memory_space<vmem>>, %arg2: memref<16x4xf32, #tpu.memory_space<vmem>>, %arg3: memref<1x4xf32, #tpu.memory_space<vmem>>, %arg4: memref<8x4xf32, #tpu.memory_space<vmem>>) attributes {dimension_semantics = [#tpu.dimension_semantics<parallel>], iteration_bounds = array<i64: 1>, scalar_prefetch = 0 : i64, scratch_operands = 0 : i64, tpu.core_type = #tpu.core_type<tc>, window_params = [{transform_indices = @transform_0, window_bounds = array<i64: 8, 16>}, {pipeline_mode = #tpu.pipeline_mode<synchronous>, transform_indices = @transform_1, window_bounds = array<i64: 16, 4>}, {pipeline_mode = #tpu.pipeline_mode<synchronous>, transform_indices = @transform_2, window_bounds = array<i64: 1, 4>}, {transform_indices = @transform_3, window_bounds = array<i64: 8, 4>}]} {
    %c0 = arith.constant 0 : index
    %c0_0 = arith.constant 0 : index
    %0 = vector.load %arg1[%c0, %c0_0] : memref<8x16xf32, #tpu.memory_space<vmem>>, vector<8x16xf32>
    %c0_1 = arith.constant 0 : index
    %c0_2 = arith.constant 0 : index
    %1 = vector.load %arg2[%c0_1, %c0_2] : memref<16x4xf32, #tpu.memory_space<vmem>>, vector<16x4xf32>
    %cst = arith.constant dense<0.000000e+00> : vector<8x4xf32>
    %2 = tpu.matmul %0, %1, %cst {dimension_numbers = #tpu.dot_dimension_numbers<[1], [0], [0], [1], [0, 0, 1, 1], [], []>} : vector<8x16xf32>, vector<16x4xf32>, vector<8x4xf32> -> vector<8x4xf32>
    %c0_3 = arith.constant 0 : index
    %c0_4 = arith.constant 0 : index
    %3 = vector.load %arg3[%c0_3, %c0_4] : memref<1x4xf32, #tpu.memory_space<vmem>>, vector<1x4xf32>
    %4 = vector.broadcast %3 : vector<1x4xf32> to vector<8x4xf32>
    %5 = arith.addf %2, %4 : vector<8x4xf32>
    %6 = arith.negf %5 : vector<8x4xf32>
    %7 = math.exp %6 : vector<8x4xf32>
    %cst_5 = arith.constant 1.000000e+00 : f32
    %8 = vector.broadcast %cst_5 : f32 to vector<8x4xf32>
    %9 = arith.addf %8, %7 : vector<8x4xf32>
    %10 = arith.divf %8, %9 : vector<8x4xf32>
    %c0_6 = arith.constant 0 : index
    %c0_7 = arith.constant 0 : index
    %11 = vector.load %arg4[%c0_6, %c0_7] : memref<8x4xf32, #tpu.memory_space<vmem>>, vector<8x4xf32>
    tpu.vector_store %arg4[%c0_6, %c0_7], %10 {strides = array<i32>} : memref<8x4xf32, #tpu.memory_space<vmem>>, vector<8x4xf32>,
    return
  }
  func.func @transform_0(%arg0: i32) -> (i32, i32) {
    %c0_i32 = arith.constant 0 : i32
    %c0_i32_0 = arith.constant 0 : i32
    return %arg0, %c0_i32 : i32, i32
  }
  func.func @transform_1(%arg0: i32) -> (i32, i32) {
    %c0_i32 = arith.constant 0 : i32
    %c0_i32_0 = arith.constant 0 : i32
    %c0_i32_1 = arith.constant 0 : i32
    return %c0_i32, %c0_i32_0 : i32, i32
  }
  func.func @transform_2(%arg0: i32) -> (i32, i32) {
    %c0_i32 = arith.constant 0 : i32
    %c0_i32_0 = arith.constant 0 : i32
    %c0_i32_1 = arith.constant 0 : i32
    return %c0_i32, %c0_i32_0 : i32, i32
  }
  func.func @transform_3(%arg0: i32) -> (i32, i32) {
    %c0_i32 = arith.constant 0 : i32
    %c0_i32_0 = arith.constant 0 : i32
    return %arg0, %c0_i32 : i32, i32
  }
}

</mosaic_0001>

<bundles_post_ra>
// kernel: tpu_custom_call.1
= control target key start
LH: loop header
LB: loop body
LE: loop exit
PB: predicated region body
PF: predicated region fallthrough
CT: control target
= control target key end

     0   :  { %v133_v0 = vmov 0.0|0.0   ;;  %vm134_vm0 = vmmov 0   ;;  %v135_v3 = vmov 0.0   ;;  %vm24_vm1 = vcmask 130048   ;;  %s171_s1 = inlined_call_operand.vmem [shape: f32[16,4], index: 1, kind: input, shape index: {}]   ;;  %s172_s0 = inlined_call_operand.vmem [shape: f32[8,16], index: 0, kind: input, shape index: {}]   ;;  %s173_s2 = inlined_call_operand.vmem [shape: f32[1,4], index: 2, kind: input, shape index: {}]   ;;  %s174_s3 = inlined_call_operand.vmem [shape: f32[8,4], index: 3, kind: output, shape index: {}]  }
   0x1   :  { %123 = vmatprep.subr.bf16.mxu0 %v133_v0  ;;  %v15_v1 = vld [vmem:[%s171_s1] sm:$0xff]  ;;  %v16_v2 = vld [vmem:[%s171_s1 + $0x8] sm:$0xff]  ;;  %120 = vmatprep.mubr.msk.f32.mxu0 %vm134_vm0, %v135_v3  ;;  %vm104_vm2 = vcmask 31744  }
   0x2   :  { %v124_v4 = vpack.c.bf16 %v16_v2, %v15_v1  ;;  %v14_v5 = vld [vmem:[%s172_s0] sm:$0xff] }
   0x3   :  { %v110_v6 = vld [vmem:[%s173_s2] ss:$0 sm:$0xff] }
   0x4   :  { %125 = vmatpush3.bf16.msra.mxu0 %v124_v4 }
   0x7   :  { %121 = vmatmul.mubr.msk.f32.vlgmr.msra.gmra.mrb[0].mxu0 %vm24_vm1, %v14_v5 }
  0xda   :  { %v94_v7 = vpop.f32.mrb[0].mxu0 }
  0xdb   :  { %v95_v8 = vadd.f32 %v110_v6, %v94_v7  ;;  %v122_v9 = vpop.f32.mrb[1].mxu0 }
  0xdd   :  { %v112_v10 = vmul.f32 -1.442695, %v95_v8 }
  0xdf   :  { %129 = vpow2.f32 %v112_v10 }
  0xe9   :  { %v130_v11 = vpop.eup %129 }
  0xea   :  { %v101_v12 = vadd.f32 1.0, %v130_v11 }
  0xec   :  { %131 = vrcp.f32 %v101_v12 }
  0xf6   :  { %v132_v13 = vpop.eup %131 }
  0xf7   :  { %105 = vst.msk [vmem:[%s174_s3] sm:$0xff] %vm104_vm2, %v132_v13 }

// kernel: tpu_custom_call.1
= control target key start
LH: loop header
LB: loop body
LE: loop exit
PB: predicated region body
PF: predicated region fallthrough
CT: control target
= control target key end

     0   :  { %v133_v0 = vmov 0.0|0.0   ;;  %vm134_vm0 = vmmov 0   ;;  %v135_v3 = vmov 0.0   ;;  %vm24_vm1 = vcmask 130048   ;;  %s171_s1 = inlined_call_operand.vmem [shape: f32[16,4], index: 1, kind: input, shape index: {}]   ;;  %s172_s0 = inlined_call_operand.vmem [shape: f32[8,16], index: 0, kind: input, shape index: {}]   ;;  %s173_s2 = inlined_call_operand.vmem [shape: f32[1,4], index: 2, kind: input, shape index: {}]   ;;  %s174_s3 = inlined_call_operand.vmem [shape: f32[8,4], index: 3, kind: output, shape index: {}]  }
   0x1   :  { %123 = vmatprep.subr.bf16.mxu0 %v133_v0  ;;  %v15_v1 = vld [vmem:[%s171_s1] sm:$0xff]  ;;  %v16_v2 = vld [vmem:[%s171_s1 + $0x8] sm:$0xff]  ;;  %120 = vmatprep.mubr.msk.f32.mxu0 %vm134_vm0, %v135_v3  ;;  %vm104_vm2 = vcmask 31744  }
   0x2   :  { %v124_v4 = vpack.c.bf16 %v16_v2, %v15_v1  ;;  %v14_v5 = vld [vmem:[%s172_s0] sm:$0xff] }
   0x3   :  { %v110_v6 = vld [vmem:[%s173_s2] ss:$0 sm:$0xff] }
   0x4   :  { %125 = vmatpush3.bf16.msra.mxu0 %v124_v4 }
   0x7   :  { %121 = vmatmul.mubr.msk.f32.vlgmr.msra.gmra.mrb[0].mxu0 %vm24_vm1, %v14_v5 }
  0xda   :  { %v94_v7 = vpop.f32.mrb[0].mxu0 }
  0xdb   :  { %v95_v8 = vadd.f32 %v110_v6, %v94_v7  ;;  %v122_v9 = vpop.f32.mrb[1].mxu0 }
  0xdd   :  { %v112_v10 = vmul.f32 -1.442695, %v95_v8 }
  0xdf   :  { %129 = vpow2.f32 %v112_v10 }
  0xe9   :  { %v130_v11 = vpop.eup %129 }
  0xea   :  { %v101_v12 = vadd.f32 1.0, %v130_v11 }
  0xec   :  { %131 = vrcp.f32 %v101_v12 }
  0xf6   :  { %v132_v13 = vpop.eup %131 }
  0xf7   :  { %105 = vst.msk [vmem:[%s174_s3] sm:$0xff] %vm104_vm2, %v132_v13 }

</bundles_post_ra>
